<compile_context>
chip_gen: v7x
topology: tpu7x:2x2x1
jax: 0.10.0
libtpu: 0.0.40
codegen_flags: <defaults>
</compile_context>

<pallas_src>
import functools

import jax
import jax.numpy as jnp
from jax import lax
from jax.experimental import pallas as pl
from jax.experimental.pallas import tpu as pltpu

EPS_BN = 1e-5      # nn.BatchNorm1d eps
EPS_NORM = 1e-12   # F.normalize eps
LANE = 128
ROW_PAD = 16       # node-row padding (bf16 sublane-pair friendly)


def _round_up(x, m):
    return ((x + m - 1) // m) * m


def _full_spec(shape):
    nd = len(shape)
    return pl.BlockSpec(shape, lambda i, nd=nd: (0,) * nd)


# ----------------------------- Pallas kernel -----------------------------

def _make_gbyol_kernel(n_gcn, n_true, n_pad, share_target):
    """Fused kernel: both views (row-stacked), encoder(s), predictor, BYOL loss.

    Weight-stack layout (each (PAD, PAD) bf16, pre-transposed + BN-folded):
      [0 .. n_gcn-1]         online GCN layers (encoder BN folded into last)
      [n_gcn]                online projection linear (+proj BN)
      [... same block again] target encoder   (only if share_target=False)
      [last]                 predictor linear (+pred BN)
    Bias slab (f32) uses the same row indices.
    """
    stride = n_gcn + 1
    pred_idx = stride if share_target else 2 * stride

    def kernel(a1_ref, a2_ref, x_ref, w_ref, b_ref, rep_ref, loss_ref):
        def mm(h, i):                     # bf16 MXU feed, f32 accumulate
            return jnp.dot(h.astype(jnp.bfloat16), w_ref[i],
                           preferred_element_type=jnp.float32)

        def bias(i):                      # (1, PAD) f32, broadcasts over rows
            return b_ref[pl.ds(i, 1), :]

        a1 = a1_ref[...]                  # (n_pad, n_pad) bf16
        a2 = a2_ref[...]

        def aggregate(xw):                # per-view A_hat @ (X W), views stacked on rows
            xwb = xw.astype(jnp.bfloat16)
            top = jnp.dot(a1, xwb[:n_pad], preferred_element_type=jnp.float32)
            bot = jnp.dot(a2, xwb[n_pad:], preferred_element_type=jnp.float32)
            return jnp.concatenate([top, bot], axis=0)

        def encoder(base):
            h = x_ref[...]                                   # (2*n_pad, PAD) bf16
            for l in range(n_gcn):                           # GCNConv: A_hat @ (X@W) + b
                h = aggregate(mm(h, base + l)) + bias(base + l)
                # F.dropout -> identity (eval mode); encoder BN folded into last layer
            rep = h
            # projection head: Linear(+BN folded) -> ReLU -> Dropout(identity)
            proj = jnp.maximum(mm(rep, base + n_gcn) + bias(base + n_gcn), 0.0)
            return rep, proj

        rep_pair, on_pair = encoder(0)                       # online, both views
        # target encoder == deepcopy(online) on first call -> reuse online outputs
        tg_pair = on_pair if share_target else encoder(stride)[1]

        # online predictor: Linear(+BN folded) -> ReLU -> Dropout(identity)
        p_pair = jnp.maximum(mm(on_pair, pred_idx) + bias(pred_idx), 0.0)

        rep_ref[...] = rep_pair                              # lane-dense (2*n_pad, PAD)

        # symmetric BYOL loss: pair p(view1) with target(view2) and vice versa
        tg_sw = jnp.concatenate([tg_pair[n_pad:], tg_pair[:n_pad]], axis=0)

        dot = jnp.sum(p_pair * tg_sw, axis=-1, keepdims=True)
        sp = jnp.sum(p_pair * p_pair, axis=-1, keepdims=True)
        st = jnp.sum(tg_sw * tg_sw, axis=-1, keepdims=True)
        eps2 = EPS_NORM * EPS_NORM
        # 2 - 2*cos with F.normalize's max(||.||, eps) clamp; single EUP rsqrt per row
        cos = dot * lax.rsqrt(jnp.maximum(sp, eps2) * jnp.maximum(st, eps2))

        row = lax.broadcasted_iota(jnp.int32, cos.shape, 0)
        valid = (row % n_pad) < n_true                       # mask padded node rows
        per_row = jnp.where(valid, 2.0 - 2.0 * cos, 0.0)
        # (loss1 + loss2).mean() == sum over both stacked views / N
        loss_ref[...] = (jnp.sum(per_row) / float(n_true)) * jnp.ones((1, 1), jnp.float32)

    return kernel


def _gbyol_pallas(a1, a2, x_pair, w_stack, b_stack, n_gcn, n_true, share_target):
    n_pad = a1.shape[0]
    pad = x_pair.shape[1]
    kernel = _make_gbyol_kernel(n_gcn, n_true, n_pad, share_target)
    in_specs = [_full_spec(a1.shape), _full_spec(a2.shape), _full_spec(x_pair.shape),
                _full_spec(w_stack.shape), _full_spec(b_stack.shape)]
    out_shape = (jax.ShapeDtypeStruct((2 * n_pad, pad), jnp.float32),
                 jax.ShapeDtypeStruct((1, 1), jnp.float32))
    out_specs = (_full_spec((2 * n_pad, pad)), _full_spec((1, 1)))
    return pl.pallas_call(
        kernel,
        out_shape=out_shape,
        grid=(1,),
        in_specs=in_specs,
        out_specs=out_specs,
        compiler_params=pltpu.CompilerParams(dimension_semantics=("arbitrary",)),
    )(a1, a2, x_pair, w_stack, b_stack)


# ----------------------------- plain-JAX glue -----------------------------

def gcn_norm_dense(edge_index, num_nodes, edge_weight=None):
    """Dense D^-1/2 (A + I) D^-1/2 as used by PyG GCNConv (source->target flow)."""
    src, dst = edge_index[0], edge_index[1]
    if edge_weight is None:
        edge_weight = jnp.ones(src.shape[0], jnp.float32)
    a = jnp.zeros((num_nodes, num_nodes), jnp.float32).at[dst, src].add(edge_weight)
    a = a + jnp.eye(num_nodes, dtype=jnp.float32)        # self loops, fill_value = 1
    deg = jnp.sum(a, axis=1)
    dinv = jnp.where(deg > 0, 1.0 / jnp.sqrt(deg), 0.0)
    return a * dinv[:, None] * dinv[None, :]


def init_params(key, layer_config):
    keys = iter(jax.random.split(key, 64))

    def lin(f_in, f_out):
        w = jax.random.normal(next(keys), (f_out, f_in), jnp.float32) / jnp.sqrt(float(f_in))
        b = 0.1 * jax.random.normal(next(keys), (f_out,), jnp.float32)
        return w, b

    def bn(d):
        g = 1.0 + 0.1 * jax.random.normal(next(keys), (d,), jnp.float32)
        bt = 0.1 * jax.random.normal(next(keys), (d,), jnp.float32)
        rm = 0.1 * jax.random.normal(next(keys), (d,), jnp.float32)
        rv = 1.0 + 0.1 * jnp.abs(jax.random.normal(next(keys), (d,), jnp.float32))
        return g, bt, rm, rv

    rep = layer_config[-1]
    encoder = dict(
        gcn=[lin(layer_config[i - 1], layer_config[i]) for i in range(1, len(layer_config))],
        enc_norm=bn(rep),
        proj_lin=lin(rep, rep),
        proj_bn=bn(rep),
    )
    predictor = dict(lin=lin(rep, rep), bn=bn(rep))
    # target encoder = deepcopy of online encoder (first-call semantics)
    target = jax.tree_util.tree_map(lambda v: v, encoder)
    return dict(online=encoder, target=target, pred=predictor)


def prepare_kernel_params(params, layer_config, share_target=True):
    """Fold eval-mode BN into weights/biases, pre-transpose, pad to 128 lanes,
    pack into one bf16 weight stack + one f32 bias slab (done once)."""
    pad = _round_up(max(layer_config), LANE)
    n_gcn = len(layer_config) - 1

    def fold_linear(w, b, bn=None):
        wt = w.T                                    # (f_in, f_out), transposed once
        if bn is not None:
            g, bt, rm, rv = bn
            scale = g * lax.rsqrt(rv + EPS_BN)
            wt = wt * scale[None, :]
            b = (b - rm) * scale + bt
        return wt, b

    def enc_layers(enc):
        out = []
        for i, (w, b) in enumerate(enc["gcn"]):
            bn = enc["enc_norm"] if i == n_gcn - 1 else None   # encoder BN -> last GCN
            out.append(fold_linear(w, b, bn))
        out.append(fold_linear(*enc["proj_lin"], enc["proj_bn"]))
        return out

    layers = enc_layers(params["online"])
    if not share_target:                            # EMA-diverged target gets its own slots
        layers += enc_layers(params["target"])
    layers.append(fold_linear(*params["pred"]["lin"], params["pred"]["bn"]))

    n_w = len(layers)
    w_stack = jnp.zeros((n_w, pad, pad), jnp.float32)
    b_stack = jnp.zeros((_round_up(n_w, 8), pad), jnp.float32)
    for i, (w, b) in enumerate(layers):
        w_stack = w_stack.at[i, :w.shape[0], :w.shape[1]].set(w)
        b_stack = b_stack.at[i, :b.shape[0]].set(b)
    return w_stack.astype(jnp.bfloat16), b_stack


def gbyol_forward(w_stack, b_stack, x1, x2, edge_index_v1, edge_index_v2,
                  edge_weight_v1=None, edge_weight_v2=None, *,
                  n_gcn, rep_dim, share_target=True):
    n = x1.shape[0]
    pad = w_stack.shape[-1]
    n_pad = _round_up(n, ROW_PAD)

    def pad_a(ei, ew):
        a = gcn_norm_dense(ei, n, ew)
        return jnp.zeros((n_pad, n_pad), jnp.float32).at[:n, :n].set(a).astype(jnp.bfloat16)

    def pad_x(x):
        return jnp.zeros((n_pad, pad), jnp.bfloat16).at[:n, :x.shape[1]].set(
            x.astype(jnp.bfloat16))

    a1 = pad_a(edge_index_v1, edge_weight_v1)
    a2 = pad_a(edge_index_v2, edge_weight_v2)
    x_pair = jnp.concatenate([pad_x(x1), pad_x(x2)], axis=0)   # views stacked on rows

    rep_pair, loss = _gbyol_pallas(a1, a2, x_pair, w_stack, b_stack,
                                   n_gcn, n, share_target)
    v1_rep = rep_pair[:n, :rep_dim]
    v2_rep = rep_pair[n_pad:n_pad + n, :rep_dim]
    return v1_rep, v2_rep, loss[0, 0]


# ----------------------------- main -----------------------------

if __name__ == "__main__":
    key = jax.random.PRNGKey(0)
    k_par, k_x1, k_x2 = jax.random.split(key, 3)

    N, F_IN, HID, REP = 8, 16, 32, 32
    layer_config = [F_IN, HID, REP]
    params = init_params(k_par, layer_config)
    w_stack, b_stack = prepare_kernel_params(params, layer_config, share_target=True)

    x1 = jax.random.normal(k_x1, (N, F_IN), jnp.float32)
    x2 = jax.random.normal(k_x2, (N, F_IN), jnp.float32)

    # view 1: bidirectional ring; view 2: bidirectional skip-2 ring
    src = jnp.arange(N, dtype=jnp.int32)
    dst1 = (src + 1) % N
    dst2 = (src + 2) % N
    ei1 = jnp.stack([jnp.concatenate([src, dst1]), jnp.concatenate([dst1, src])])
    ei2 = jnp.stack([jnp.concatenate([src, dst2]), jnp.concatenate([dst2, src])])

    fwd = jax.jit(functools.partial(gbyol_forward,
                                    n_gcn=len(layer_config) - 1,
                                    rep_dim=REP,
                                    share_target=True))
    v1_rep, v2_rep, loss = fwd(w_stack, b_stack, x1, x2, ei1, ei2)
    jax.block_until_ready((v1_rep, v2_rep, loss))

    assert v1_rep.shape == (N, REP) and v2_rep.shape == (N, REP) and loss.shape == ()
    assert bool(jnp.isfinite(loss))
    print("KERNEL_OK")
</pallas_src>

<mosaic_0001>
module attributes {stable_mosaic.version = 11 : i64} {
  func.func private @main(%arg0: i32) attributes {dimension_semantics = [#tpu.dimension_semantics<core_parallel>], iteration_bounds = array<i64: 2>, tpu.core_type = #tpu.core_type<sc_scalar_subcore>, window_params = []} {
    return
  }
}

module attributes {stable_mosaic.version = 11 : i64} {
  func.func private @main(%arg0: i32) attributes {dimension_semantics = [#tpu.dimension_semantics<core_parallel>], iteration_bounds = array<i64: 2>, tpu.core_type = #tpu.core_type<sc_scalar_subcore>, window_params = []} {
    return
  }
}

module attributes {stable_mosaic.version = 11 : i64} {
  func.func @kernel(%arg0: i32, %arg1: memref<16x16xbf16, #tpu.memory_space<vmem>>, %arg2: memref<16x16xbf16, #tpu.memory_space<vmem>>, %arg3: memref<32x128xbf16, #tpu.memory_space<vmem>>, %arg4: memref<4x128x128xbf16, #tpu.memory_space<vmem>>, %arg5: memref<8x128xf32, #tpu.memory_space<vmem>>, %arg6: memref<32x128xf32, #tpu.memory_space<vmem>>, %arg7: memref<1x1xf32, #tpu.memory_space<vmem>>) attributes {dimension_semantics = [#tpu.dimension_semantics<arbitrary>], iteration_bounds = array<i64: 1>, scalar_prefetch = 0 : i64, scratch_operands = 0 : i64, tpu.core_type = #tpu.core_type<tc>, window_params = [{pipeline_mode = #tpu.pipeline_mode<synchronous>, transform_indices = @transform_0, window_bounds = array<i64: 16, 16>}, {pipeline_mode = #tpu.pipeline_mode<synchronous>, transform_indices = @transform_1, window_bounds = array<i64: 16, 16>}, {pipeline_mode = #tpu.pipeline_mode<synchronous>, transform_indices = @transform_2, window_bounds = array<i64: 32, 128>}, {pipeline_mode = #tpu.pipeline_mode<synchronous>, transform_indices = @transform_3, window_bounds = array<i64: 4, 128, 128>}, {pipeline_mode = #tpu.pipeline_mode<synchronous>, transform_indices = @transform_4, window_bounds = array<i64: 8, 128>}, {pipeline_mode = #tpu.pipeline_mode<synchronous>, transform_indices = @transform_5, window_bounds = array<i64: 32, 128>}, {pipeline_mode = #tpu.pipeline_mode<synchronous>, transform_indices = @transform_6, window_bounds = array<i64: 1, 1>}]} {
    %c0 = arith.constant 0 : index
    %c0_0 = arith.constant 0 : index
    %0 = vector.load %arg1[%c0, %c0_0] : memref<16x16xbf16, #tpu.memory_space<vmem>>, vector<16x16xbf16>
    %c0_1 = arith.constant 0 : index
    %c0_2 = arith.constant 0 : index
    %1 = vector.load %arg2[%c0_1, %c0_2] : memref<16x16xbf16, #tpu.memory_space<vmem>>, vector<16x16xbf16>
    %c0_3 = arith.constant 0 : index
    %c0_4 = arith.constant 0 : index
    %2 = vector.load %arg3[%c0_3, %c0_4] : memref<32x128xbf16, #tpu.memory_space<vmem>>, vector<32x128xbf16>
    %c0_5 = arith.constant 0 : index
    %c0_6 = arith.constant 0 : index
    %c0_7 = arith.constant 0 : index
    %3 = vector.load %arg4[%c0_5, %c0_6, %c0_7] : memref<4x128x128xbf16, #tpu.memory_space<vmem>>, vector<1x128x128xbf16>
    %4 = vector.shape_cast %3 : vector<1x128x128xbf16> to vector<128x128xbf16>
    %cst = arith.constant dense<0.000000e+00> : vector<32x128xf32>
    %5 = tpu.matmul %2, %4, %cst {dimension_numbers = #tpu.dot_dimension_numbers<[1], [0], [0], [1], [0, 0, 1, 1], [], []>} : vector<32x128xbf16>, vector<128x128xbf16>, vector<32x128xf32> -> vector<32x128xf32>
    %6 = arith.truncf %5 : vector<32x128xf32> to vector<32x128xbf16>
    %7 = vector.extract_strided_slice %6 {offsets = [0, 0], sizes = [16, 128], strides = [1, 1]} : vector<32x128xbf16> to vector<16x128xbf16>
    %cst_8 = arith.constant dense<0.000000e+00> : vector<16x128xf32>
    %8 = tpu.matmul %0, %7, %cst_8 {dimension_numbers = #tpu.dot_dimension_numbers<[1], [0], [0], [1], [0, 0, 1, 1], [], []>} : vector<16x16xbf16>, vector<16x128xbf16>, vector<16x128xf32> -> vector<16x128xf32>
    %9 = vector.extract_strided_slice %6 {offsets = [16, 0], sizes = [16, 128], strides = [1, 1]} : vector<32x128xbf16> to vector<16x128xbf16>
    %cst_9 = arith.constant dense<0.000000e+00> : vector<16x128xf32>
    %10 = tpu.matmul %1, %9, %cst_9 {dimension_numbers = #tpu.dot_dimension_numbers<[1], [0], [0], [1], [0, 0, 1, 1], [], []>} : vector<16x16xbf16>, vector<16x128xbf16>, vector<16x128xf32> -> vector<16x128xf32>
    %11 = tpu.concatenate %8, %10 in 0 : vector<16x128xf32>, vector<16x128xf32> -> vector<32x128xf32>
    %c0_10 = arith.constant 0 : index
    %c0_11 = arith.constant 0 : index
    %12 = vector.load %arg5[%c0_10, %c0_11] : memref<8x128xf32, #tpu.memory_space<vmem>>, vector<1x128xf32>
    %13 = vector.broadcast %12 : vector<1x128xf32> to vector<32x128xf32>
    %14 = arith.addf %11, %13 : vector<32x128xf32>
    %15 = arith.truncf %14 : vector<32x128xf32> to vector<32x128xbf16>
    %c1 = arith.constant 1 : index
    %c0_12 = arith.constant 0 : index
    %c0_13 = arith.constant 0 : index
    %16 = vector.load %arg4[%c1, %c0_12, %c0_13] : memref<4x128x128xbf16, #tpu.memory_space<vmem>>, vector<1x128x128xbf16>
    %17 = vector.shape_cast %16 : vector<1x128x128xbf16> to vector<128x128xbf16>
    %cst_14 = arith.constant dense<0.000000e+00> : vector<32x128xf32>
    %18 = tpu.matmul %15, %17, %cst_14 {dimension_numbers = #tpu.dot_dimension_numbers<[1], [0], [0], [1], [0, 0, 1, 1], [], []>} : vector<32x128xbf16>, vector<128x128xbf16>, vector<32x128xf32> -> vector<32x128xf32>
    %19 = arith.truncf %18 : vector<32x128xf32> to vector<32x128xbf16>
    %20 = vector.extract_strided_slice %19 {offsets = [0, 0], sizes = [16, 128], strides = [1, 1]} : vector<32x128xbf16> to vector<16x128xbf16>
    %cst_15 = arith.constant dense<0.000000e+00> : vector<16x128xf32>
    %21 = tpu.matmul %0, %20, %cst_15 {dimension_numbers = #tpu.dot_dimension_numbers<[1], [0], [0], [1], [0, 0, 1, 1], [], []>} : vector<16x16xbf16>, vector<16x128xbf16>, vector<16x128xf32> -> vector<16x128xf32>
    %22 = vector.extract_strided_slice %19 {offsets = [16, 0], sizes = [16, 128], strides = [1, 1]} : vector<32x128xbf16> to vector<16x128xbf16>
    %cst_16 = arith.constant dense<0.000000e+00> : vector<16x128xf32>
    %23 = tpu.matmul %1, %22, %cst_16 {dimension_numbers = #tpu.dot_dimension_numbers<[1], [0], [0], [1], [0, 0, 1, 1], [], []>} : vector<16x16xbf16>, vector<16x128xbf16>, vector<16x128xf32> -> vector<16x128xf32>
    %24 = tpu.concatenate %21, %23 in 0 : vector<16x128xf32>, vector<16x128xf32> -> vector<32x128xf32>
    %c1_17 = arith.constant 1 : index
    %c0_18 = arith.constant 0 : index
    %25 = vector.load %arg5[%c1_17, %c0_18] : memref<8x128xf32, #tpu.memory_space<vmem>>, vector<1x128xf32>
    %26 = vector.broadcast %25 : vector<1x128xf32> to vector<32x128xf32>
    %27 = arith.addf %24, %26 : vector<32x128xf32>
    %28 = arith.truncf %27 : vector<32x128xf32> to vector<32x128xbf16>
    %c2 = arith.constant 2 : index
    %c0_19 = arith.constant 0 : index
    %c0_20 = arith.constant 0 : index
    %29 = vector.load %arg4[%c2, %c0_19, %c0_20] : memref<4x128x128xbf16, #tpu.memory_space<vmem>>, vector<1x128x128xbf16>
    %30 = vector.shape_cast %29 : vector<1x128x128xbf16> to vector<128x128xbf16>
    %cst_21 = arith.constant dense<0.000000e+00> : vector<32x128xf32>
    %31 = tpu.matmul %28, %30, %cst_21 {dimension_numbers = #tpu.dot_dimension_numbers<[1], [0], [0], [1], [0, 0, 1, 1], [], []>} : vector<32x128xbf16>, vector<128x128xbf16>, vector<32x128xf32> -> vector<32x128xf32>
    %c2_22 = arith.constant 2 : index
    %c0_23 = arith.constant 0 : index
    %32 = vector.load %arg5[%c2_22, %c0_23] : memref<8x128xf32, #tpu.memory_space<vmem>>, vector<1x128xf32>
    %33 = vector.broadcast %32 : vector<1x128xf32> to vector<32x128xf32>
    %34 = arith.addf %31, %33 : vector<32x128xf32>
    %cst_24 = arith.constant 0.000000e+00 : f32
    %35 = vector.broadcast %cst_24 : f32 to vector<32x128xf32>
    %36 = arith.maximumf %34, %35 : vector<32x128xf32>
    %37 = arith.truncf %36 : vector<32x128xf32> to vector<32x128xbf16>
    %c3 = arith.constant 3 : index
    %c0_25 = arith.constant 0 : index
    %c0_26 = arith.constant 0 : index
    %38 = vector.load %arg4[%c3, %c0_25, %c0_26] : memref<4x128x128xbf16, #tpu.memory_space<vmem>>, vector<1x128x128xbf16>
    %39 = vector.shape_cast %38 : vector<1x128x128xbf16> to vector<128x128xbf16>
    %cst_27 = arith.constant dense<0.000000e+00> : vector<32x128xf32>
    %40 = tpu.matmul %37, %39, %cst_27 {dimension_numbers = #tpu.dot_dimension_numbers<[1], [0], [0], [1], [0, 0, 1, 1], [], []>} : vector<32x128xbf16>, vector<128x128xbf16>, vector<32x128xf32> -> vector<32x128xf32>
    %c3_28 = arith.constant 3 : index
    %c0_29 = arith.constant 0 : index
    %41 = vector.load %arg5[%c3_28, %c0_29] : memref<8x128xf32, #tpu.memory_space<vmem>>, vector<1x128xf32>
    %42 = vector.broadcast %41 : vector<1x128xf32> to vector<32x128xf32>
    %43 = arith.addf %40, %42 : vector<32x128xf32>
    %cst_30 = arith.constant 0.000000e+00 : f32
    %44 = vector.broadcast %cst_30 : f32 to vector<32x128xf32>
    %45 = arith.maximumf %43, %44 : vector<32x128xf32>
    %c0_31 = arith.constant 0 : index
    %c0_32 = arith.constant 0 : index
    %46 = vector.load %arg6[%c0_31, %c0_32] : memref<32x128xf32, #tpu.memory_space<vmem>>, vector<32x128xf32>
    tpu.vector_store %arg6[%c0_31, %c0_32], %27 {strides = array<i32>} : memref<32x128xf32, #tpu.memory_space<vmem>>, vector<32x128xf32>,
    %47 = vector.extract_strided_slice %36 {offsets = [16, 0], sizes = [16, 128], strides = [1, 1]} : vector<32x128xf32> to vector<16x128xf32>
    %48 = vector.extract_strided_slice %36 {offsets = [0, 0], sizes = [16, 128], strides = [1, 1]} : vector<32x128xf32> to vector<16x128xf32>
    %49 = tpu.concatenate %47, %48 in 0 : vector<16x128xf32>, vector<16x128xf32> -> vector<32x128xf32>
    %50 = arith.mulf %45, %49 : vector<32x128xf32>
    %cst_33 = arith.constant dense<0.000000e+00> : vector<32xf32>
    %51 = vector.multi_reduction <add>, %50, %cst_33 [1] : vector<32x128xf32> to vector<32xf32>
    %52 = vector.shape_cast %51 : vector<32xf32> to vector<32x1xf32>
    %53 = arith.mulf %45, %45 : vector<32x128xf32>
    %cst_34 = arith.constant dense<0.000000e+00> : vector<32xf32>
    %54 = vector.multi_reduction <add>, %53, %cst_34 [1] : vector<32x128xf32> to vector<32xf32>
    %55 = vector.shape_cast %54 : vector<32xf32> to vector<32x1xf32>
    %56 = arith.mulf %49, %49 : vector<32x128xf32>
    %cst_35 = arith.constant dense<0.000000e+00> : vector<32xf32>
    %57 = vector.multi_reduction <add>, %56, %cst_35 [1] : vector<32x128xf32> to vector<32xf32>
    %58 = vector.shape_cast %57 : vector<32xf32> to vector<32x1xf32>
    %cst_36 = arith.constant 1.000000e-24 : f32
    %59 = vector.broadcast %cst_36 : f32 to vector<32x1xf32>
    %60 = arith.maximumf %55, %59 : vector<32x1xf32>
    %cst_37 = arith.constant 1.000000e-24 : f32
    %61 = vector.broadcast %cst_37 : f32 to vector<32x1xf32>
    %62 = arith.maximumf %58, %61 : vector<32x1xf32>
    %63 = arith.mulf %60, %62 : vector<32x1xf32>
    %64 = math.rsqrt %63 : vector<32x1xf32>
    %65 = arith.mulf %52, %64 : vector<32x1xf32>
    %66 = tpu.iota {dimensions = array<i32: 0>} : vector<32x1xi32>
    %c16_i32 = arith.constant 16 : i32
    %c0_i32 = arith.constant 0 : i32
    %67 = arith.cmpi eq, %c16_i32, %c0_i32 : i32
    %c1_i32 = arith.constant 1 : i32
    %68 = arith.select %67, %c1_i32, %c16_i32 : i32
    %69 = vector.broadcast %68 : i32 to vector<32x1xi32>
    %70 = arith.remsi %66, %69 : vector<32x1xi32>
    %c0_i32_38 = arith.constant 0 : i32
    %71 = vector.broadcast %c0_i32_38 : i32 to vector<32x1xi32>
    %72 = arith.cmpi ne, %70, %71 : vector<32x1xi32>
    %c0_i32_39 = arith.constant 0 : i32
    %73 = vector.broadcast %c0_i32_39 : i32 to vector<32x1xi32>
    %74 = arith.cmpi slt, %70, %73 : vector<32x1xi32>
    %c0_i32_40 = arith.constant 0 : i32
    %75 = arith.cmpi slt, %68, %c0_i32_40 : i32
    %76 = vector.broadcast %75 : i1 to vector<32x1xi1>
    %77 = vector.broadcast %76 : vector<32x1xi1> to vector<32x1xi1>
    %78 = arith.xori %74, %77 : vector<32x1xi1>
    %79 = arith.andi %78, %72 : vector<32x1xi1>
    %80 = vector.broadcast %68 : i32 to vector<32x1xi32>
    %81 = arith.addi %70, %80 : vector<32x1xi32>
    %82 = arith.select %79, %81, %70 : vector<32x1xi1>, vector<32x1xi32>
    %c8_i32 = arith.constant 8 : i32
    %83 = vector.broadcast %c8_i32 : i32 to vector<32x1xi32>
    %84 = arith.cmpi slt, %82, %83 : vector<32x1xi32>
    %cst_41 = arith.constant 2.000000e+00 : f32
    %85 = vector.broadcast %cst_41 : f32 to vector<32x1xf32>
    %86 = arith.mulf %85, %65 : vector<32x1xf32>
    %cst_42 = arith.constant 2.000000e+00 : f32
    %87 = vector.broadcast %cst_42 : f32 to vector<32x1xf32>
    %88 = arith.subf %87, %86 : vector<32x1xf32>
    %cst_43 = arith.constant 0.000000e+00 : f32
    %89 = vector.broadcast %cst_43 : f32 to vector<32x1xf32>
    %90 = arith.select %84, %88, %89 : vector<32x1xi1>, vector<32x1xf32>
    %91 = vector.shape_cast %90 : vector<32x1xf32> to vector<1x32x1xf32>
    %cst_44 = arith.constant dense<0.000000e+00> : vector<1xf32>
    %92 = vector.multi_reduction <add>, %91, %cst_44 [1, 2] : vector<1x32x1xf32> to vector<1xf32>
    %93 = vector.shape_cast %92 : vector<1xf32> to vector<1x1x1xf32>
    %94 = vector.extract %93[0, 0, 0] : f32 from vector<1x1x1xf32>
    %cst_45 = arith.constant 8.000000e+00 : f32
    %95 = arith.divf %94, %cst_45 : f32
    %cst_46 = arith.constant 1.000000e+00 : f32
    %96 = vector.broadcast %cst_46 : f32 to vector<1x1xf32>
    %97 = vector.broadcast %95 : f32 to vector<1x1xf32>
    %98 = arith.mulf %97, %96 : vector<1x1xf32>
    %c0_47 = arith.constant 0 : index
    %c0_48 = arith.constant 0 : index
    %99 = vector.load %arg7[%c0_47, %c0_48] : memref<1x1xf32, #tpu.memory_space<vmem>>, vector<1x1xf32>
    tpu.vector_store %arg7[%c0_47, %c0_48], %98 {strides = array<i32>} : memref<1x1xf32, #tpu.memory_space<vmem>>, vector<1x1xf32>,
    return
  }
  func.func @transform_0(%arg0: i32) -> (i32, i32) {
    %c0_i32 = arith.constant 0 : i32
    %c0_i32_0 = arith.constant 0 : i32
    %c0_i32_1 = arith.constant 0 : i32
    return %c0_i32, %c0_i32_0 : i32, i32
  }
  func.func @transform_1(%arg0: i32) -> (i32, i32) {
    %c0_i32 = arith.constant 0 : i32
    %c0_i32_0 = arith.constant 0 : i32
    %c0_i32_1 = arith.constant 0 : i32
    return %c0_i32, %c0_i32_0 : i32, i32
  }
  func.func @transform_2(%arg0: i32) -> (i32, i32) {
    %c0_i32 = arith.constant 0 : i32
    %c0_i32_0 = arith.constant 0 : i32
    %c0_i32_1 = arith.constant 0 : i32
    return %c0_i32, %c0_i32_0 : i32, i32
  }
  func.func @transform_3(%arg0: i32) -> (i32, i32, i32) {
    %c0_i32 = arith.constant 0 : i32
    %c0_i32_0 = arith.constant 0 : i32
    %c0_i32_1 = arith.constant 0 : i32
    %c0_i32_2 = arith.constant 0 : i32
    return %c0_i32, %c0_i32_0, %c0_i32_1 : i32, i32, i32
  }
  func.func @transform_4(%arg0: i32) -> (i32, i32) {
    %c0_i32 = arith.constant 0 : i32
    %c0_i32_0 = arith.constant 0 : i32
    %c0_i32_1 = arith.constant 0 : i32
    return %c0_i32, %c0_i32_0 : i32, i32
  }
  func.func @transform_5(%arg0: i32) -> (i32, i32) {
    %c0_i32 = arith.constant 0 : i32
    %c0_i32_0 = arith.constant 0 : i32
    %c0_i32_1 = arith.constant 0 : i32
    return %c0_i32, %c0_i32_0 : i32, i32
  }
  func.func @transform_6(%arg0: i32) -> (i32, i32) {
    %c0_i32 = arith.constant 0 : i32
    %c0_i32_0 = arith.constant 0 : i32
    %c0_i32_1 = arith.constant 0 : i32
    return %c0_i32, %c0_i32_0 : i32, i32
  }
}

</mosaic_0001>

<bundles_post_ra>
// kernel: gbyol_forward.1
= control target key start
LH: loop header
LB: loop body
LE: loop exit
PB: predicated region body
PF: predicated region fallthrough
CT: control target
= control target key end

     0   :  { %s1415_s0 = inlined_call_operand.vmem [shape: bf16[16,16], index: 0, kind: input, shape index: {}]   ;;  %s1416_s1 = inlined_call_operand.vmem [shape: bf16[16,16], index: 1, kind: input, shape index: {}]   ;;  %s1417_s2 = inlined_call_operand.vmem [shape: bf16[32,128], index: 2, kind: input, shape index: {}]   ;;  %s1418_s3 = inlined_call_operand.vmem [shape: bf16[4,128,128], index: 3, kind: input, shape index: {}]   ;;  %s1419_s4 = inlined_call_operand.vmem [shape: f32[8,128], index: 4, kind: input, shape index: {}]   ;;  %s1420_s5 = inlined_call_operand.vmem [shape: f32[32,128], index: 5, kind: output, shape index: {0}]   ;;  %s1421_s6 = inlined_call_operand.hbm [shape: f32[1,1], index: 6, kind: output, shape index: {1}]  }
   0x1   :  { %v1145_v0 = vld [vmem:[%s1418_s3] sm:$0xff]   ;;  %v1146_v1 = vld [vmem:[%s1418_s3 + $0x8] sm:$0xff]   ;;  %v1147_v2 = vld [vmem:[%s1418_s3 + $0x10] sm:$0xff]  }
   0x2   :  { %1036 = vmatprep.subr.bf16.mxu0 %v1145_v0  ;;  %v1148_v3 = vld [vmem:[%s1418_s3 + $0x18] sm:$0xff]   ;;  %v1153_v4 = vld [vmem:[%s1417_s2] sm:$0xff]   ;;  %v1150_v6 = vld [vmem:[%s1418_s3 + $0x28] sm:$0xff]  }
   0x3   :  { %1037 = vmatpush3.bf16.msra.mxu0 %v1145_v0  ;;  %v1149_v5 = vld [vmem:[%s1418_s3 + $0x20] sm:$0xff]   ;;  %1052 = vmatprep.mubr.bf16.mxu0 %v1153_v4  ;;  %v1151_v7 = vld [vmem:[%s1418_s3 + $0x30] sm:$0xff]   ;;  %v1152_v8 = vld [vmem:[%s1418_s3 + $0x38] sm:$0xff]  }
   0x4   :  { %1038 = vmatprep.subr.bf16.mxu0 %v1146_v1 }
   0x7   :  { %1039 = vmatpush3.bf16.msra.mxu0 %v1146_v1 }
   0x8   :  { %1040 = vmatprep.subr.bf16.mxu0 %v1147_v2 }
   0xb   :  { %1041 = vmatpush3.bf16.msra.mxu0 %v1147_v2 }
   0xc   :  { %1042 = vmatprep.subr.bf16.mxu0 %v1148_v3 }
   0xf   :  { %1043 = vmatpush3.bf16.msra.mxu0 %v1148_v3 }
  0x10   :  { %1044 = vmatprep.subr.bf16.mxu0 %v1149_v5 }
  0x13   :  { %1045 = vmatpush3.bf16.msra.mxu0 %v1149_v5 }
  0x14   :  { %1046 = vmatprep.subr.bf16.mxu0 %v1150_v6 }
  0x17   :  { %1047 = vmatpush3.bf16.msra.mxu0 %v1150_v6 }
  0x18   :  { %1048 = vmatprep.subr.bf16.mxu0 %v1151_v7 }
  0x1b   :  { %1049 = vmatpush3.bf16.msra.mxu0 %v1151_v7 }
  0x1c   :  { %12 = vsyncpa [#allocation3], 0  ;;  %1050 = vmatprep.subr.bf16.mxu0 %v1152_v8  ;;  %v1154_v9 = vld [vmem:[%s1417_s2 + $0x8] sm:$0xff]   ;;  %v1209_v10 = vmov 0.0   ;;  %vm1210_vm0 = vmmov 0   ;;  %v1286_v17 = vld [vmem:[%s1415_s0] sm:$0xff]  }
  0x1d   :  { %1056 = vmatprep.subr.bf16.mxu1 %v1209_v10  ;;  %1058 = vmatprep.mubr.msk.bf16.mxu1 %vm1210_vm0, %v1209_v10  ;;  %vm164_vm1 = vcmask 130048   ;;  %v1157_v18 = vld [vmem:[%s1418_s3 + $0x40] sm:$0xff]   ;;  %v1158_v20 = vld [vmem:[%s1418_s3 + $0x48] sm:$0xff]   ;;  %v1159_v21 = vld [vmem:[%s1418_s3 + $0x50] sm:$0xff]   ;;  %vm855_vm2 = vcmask 7168   ;;  %vm876_vm3 = vcmask 0  }
  0x1e   :  { %v1299_v19 = vld [vmem:[%s1416_s1] sm:$0xff]   ;;  %v1160_v22 = vld [vmem:[%s1418_s3 + $0x58] sm:$0xff]   ;;  %v1162_v24 = vld [vmem:[%s1418_s3 + $0x68] sm:$0xff]  }
  0x1f   :  { %1051 = vmatpush3.bf16.msra.mxu0 %v1152_v8  ;;  %v1161_v23 = vld [vmem:[%s1418_s3 + $0x60] sm:$0xff]   ;;  %v1163_v25 = vld [vmem:[%s1418_s3 + $0x70] sm:$0xff]   ;;  %v1164_v26 = vld [vmem:[%s1418_s3 + $0x78] sm:$0xff]  }
  0x20   :  { %1088 = vmatprep.subr.bf16.mxu0 %v1209_v10  ;;  %v910_v28 = vld [vmem:[%s1419_s4] ss:$0 sm:$0xff]  ;;  %v1166_v43 = vld [vmem:[%s1418_s3 + $0x88] sm:$0xff]   ;;  %v1167_v44 = vld [vmem:[%s1418_s3 + $0x90] sm:$0xff]  }
  0x21   :  { %v1165_v42 = vld [vmem:[%s1418_s3 + $0x80] sm:$0xff]   ;;  %v1168_v45 = vld [vmem:[%s1418_s3 + $0x98] sm:$0xff]   ;;  %v1170_v53 = vld [vmem:[%s1418_s3 + $0xa8] sm:$0xff]  }
  0x22   :  { %1053 = vmatmul.mubr.bf16.vlgmr.msra.gmra.mrb[0].mxu0 %v1154_v9  ;;  %v1169_v46 = vld [vmem:[%s1418_s3 + $0xa0] sm:$0xff]   ;;  %v1171_v54 = vld [vmem:[%s1418_s3 + $0xb0] sm:$0xff]   ;;  %v1172_v55 = vld [vmem:[%s1418_s3 + $0xb8] sm:$0xff]  }
  0x23   :  { %1090 = vmatprep.mubr.msk.bf16.mxu0 %vm1210_vm0, %v1209_v10  ;;  %v1173_v56 = vld [vmem:[%s1418_s3 + $0xc0] sm:$0xff]   ;;  %v1174_v57 = vld [vmem:[%s1418_s3 + $0xc8] sm:$0xff]   ;;  %v1175_v58 = vld [vmem:[%s1418_s3 + $0xd0] sm:$0xff]  }
  0x24   :  { %v1176_v59 = vld [vmem:[%s1418_s3 + $0xd8] sm:$0xff]   ;;  %v1177_v60 = vld [vmem:[%s1418_s3 + $0xe0] sm:$0xff]   ;;  %v1178_v61 = vld [vmem:[%s1418_s3 + $0xe8] sm:$0xff]  }
  0x25   :  { %v937_v62 = vld [vmem:[%s1419_s4 + $0x1] ss:$0 sm:$0xff] }
  0xf5   :  { %v1054_v11 = vpop.f32.mrb[0].mxu0 }
  0xf6   :  { %v142_v12 = vpop.f32.mrb[1].mxu0 }
  0xf7   :  { %v1055_v13 = vpop.f32.mrb[2].mxu0 }
  0xf8   :  { %v158_v14 = vpack.c.bf16 %v1055_v13, %v1054_v11  ;;  %v145_v15 = vpop.f32.mrb[3].mxu0  ;;  %v1179_v13 = vld [vmem:[%s1418_s3 + $0xf0] sm:$0xff]  }
  0xf9   :  { %v157_v16 = vpack.c.bf16 %v145_v15, %v142_v12  ;;  %v954_v15 = vld [vmem:[%s1419_s4 + $0x2] ss:$0 sm:$0xff] }
  0xfb   :  { %1057 = vmatpush3.bf16.msra.mxu1 %v157_v16 }
  0xfc   :  { %1062 = vmatprep.subr.bf16.mxu1 %v1209_v10 }
  0xfe   :  { %1059 = vmatmul.mubr.msk.bf16.vlgmr.msra.gmra.mrb[0].mxu1 %vm164_vm1, %v1286_v17 }
  0xff   :  { %1063 = vmatpush3.bf16.msra.mxu1 %v158_v14  ;;  %1064 = vmatprep.mubr.msk.bf16.mxu1 %vm1210_vm0, %v1209_v10  ;;  %v1180_v14 = vld [vmem:[%s1418_s3 + $0xf8] sm:$0xff]  }
 0x100   :  { %1068 = vmatprep.subr.bf16.mxu1 %v1157_v18 }
 0x106   :  { %1065 = vmatmul.mubr.msk.bf16.vlgmr.msra.gmra.mrb[4].mxu1 %vm164_vm1, %v1299_v19 }
 0x107   :  { %1069 = vmatpush3.bf16.msra.mxu1 %v1157_v18 }
 0x108   :  { %1070 = vmatprep.subr.bf16.mxu1 %v1158_v20 }
 0x10b   :  { %1071 = vmatpush3.bf16.msra.mxu1 %v1158_v20 }
 0x10c   :  { %1072 = vmatprep.subr.bf16.mxu1 %v1159_v21 }
 0x10f   :  { %1073 = vmatpush3.bf16.msra.mxu1 %v1159_v21 }
 0x110   :  { %1074 = vmatprep.subr.bf16.mxu1 %v1160_v22 }
 0x113   :  { %1075 = vmatpush3.bf16.msra.mxu1 %v1160_v22 }
 0x114   :  { %1076 = vmatprep.subr.bf16.mxu1 %v1161_v23 }
 0x117   :  { %1077 = vmatpush3.bf16.msra.mxu1 %v1161_v23 }
 0x118   :  { %1078 = vmatprep.subr.bf16.mxu1 %v1162_v24 }
 0x11b   :  { %1079 = vmatpush3.bf16.msra.mxu1 %v1162_v24 }
 0x11c   :  { %1080 = vmatprep.subr.bf16.mxu1 %v1163_v25 }
 0x11f   :  { %1081 = vmatpush3.bf16.msra.mxu1 %v1163_v25 }
 0x120   :  { %1082 = vmatprep.subr.bf16.mxu1 %v1164_v26 }
 0x123   :  { %1083 = vmatpush3.bf16.msra.mxu1 %v1164_v26 }
 0x124   :  { %1100 = vmatprep.subr.bf16.mxu1 %v1165_v42 }
 0x1d1   :  { %v202_v27 = vpop.f32.mrb[0].mxu1 }
 0x1d2   :  { %v1060_v29 = vpop.f32.mrb[1].mxu1  ;;  %v263_v31 = vadd.f32 %v910_v28, %v202_v27 }
 0x1d3   :  { %v205_v30 = vpop.f32.mrb[2].mxu1 }
 0x1d4   :  { %v264_v32 = vadd.f32 %v910_v28, %v205_v30  ;;  %v1061_v33 = vpop.f32.mrb[3].mxu1 }
 0x1d6   :  { %v267_v34 = vpack.c.bf16 %v264_v32, %v263_v31  ;;  %v979_v32 = vld [vmem:[%s1419_s4 + $0x3] ss:$0 sm:$0xff]  ;;  %s1211_s4 = smov [#allocation2]  }
 0x1d7   :  { %s886_s1 = sshll.u32 %s1211_s4, 4  ;;  %s887_s1 = int_to_ptr.vmem [resolvable:$true] %s886_s1 }
 0x1d8   :  { %1084 = vmatprep.mubr.bf16.mxu1 %v267_v34  ;;  %s1185_s29 = scalar_lea.vmem %s887_s1, 16  ;;  %s1189_s30 = scalar_lea.vmem %s887_s1, 32 }
 0x1d9   :  { %v251_v35 = vpop.f32.mrb[4].mxu1  ;;  %p1186_p0 = scmp.ne.s32.totalorder %s887_s1, %s1185_s29  ;;  %p1190_p1 = scmp.lt.s32.totalorder %s887_s1, %s887_s1 }
 0x1da   :  { %v1066_v36 = vpop.f32.mrb[5].mxu1  ;;  %v265_v38 = vadd.f32 %v910_v28, %v251_v35  ;;  %p1191_p2 = scmp.lt.s32.totalorder %s1189_s30, %s1185_s29 }
 0x1db   :  { %v254_v37 = vpop.f32.mrb[6].mxu1 }
 0x1dc   :  { %v266_v39 = vadd.f32 %v910_v28, %v254_v37  ;;  %v1067_v40 = vpop.f32.mrb[7].mxu1  ;;  %p1192_p3 = por %p1191_p2, %p1190_p1 }
 0x1de   :  { %v268_v41 = vpack.c.bf16 %v266_v39, %v265_v38  ;;  %p1193_p4 = pnand %p1192_p3, %p1186_p0 }
 0x1e0   :  { %1085 = vmatmul.mubr.bf16.vlgmr.msra.gmra.mrb[8].mxu1 %v268_v41 }
 0x1e1   :  { %1101 = vmatpush3.bf16.msra.mxu1 %v1165_v42 }
 0x1e2   :  { %1102 = vmatprep.subr.bf16.mxu1 %v1166_v43 }
 0x1e5   :  { %1103 = vmatpush3.bf16.msra.mxu1 %v1166_v43 }
 0x1e6   :  { %1104 = vmatprep.subr.bf16.mxu1 %v1167_v44 }
 0x1e9   :  { %1105 = vmatpush3.bf16.msra.mxu1 %v1167_v44 }
 0x1ea   :  { %1106 = vmatprep.subr.bf16.mxu1 %v1168_v45 }
 0x1ed   :  { %1107 = vmatpush3.bf16.msra.mxu1 %v1168_v45 }
 0x1ee   :  { %1108 = vmatprep.subr.bf16.mxu1 %v1169_v46 }
 0x1f1   :  { %1109 = vmatpush3.bf16.msra.mxu1 %v1169_v46 }
 0x1f2   :  { %1110 = vmatprep.subr.bf16.mxu1 %v1170_v53 }
 0x1f5   :  { %1111 = vmatpush3.bf16.msra.mxu1 %v1170_v53 }
 0x1f6   :  { %1112 = vmatprep.subr.bf16.mxu1 %v1171_v54 }
 0x1f9   :  { %1113 = vmatpush3.bf16.msra.mxu1 %v1171_v54 }
 0x1fa   :  { %1114 = vmatprep.subr.bf16.mxu1 %v1172_v55 }
 0x1fd   :  { %1115 = vmatpush3.bf16.msra.mxu1 %v1172_v55 }
 0x2b3   :  { %v1086_v47 = vpop.f32.mrb[8].mxu1 }
 0x2b4   :  { %v368_v48 = vpop.f32.mrb[9].mxu1 }
 0x2b5   :  { %v1087_v49 = vpop.f32.mrb[10].mxu1 }
 0x2b6   :  { %v384_v50 = vpack.c.bf16 %v1087_v49, %v1086_v47  ;;  %v371_v51 = vpop.f32.mrb[11].mxu1 }
 0x2b7   :  { %v383_v52 = vpack.c.bf16 %v371_v51, %v368_v48 }
 0x2b9   :  { %1089 = vmatpush3.bf16.msra.mxu0 %v383_v52 }
 0x2ba   :  { %1094 = vmatprep.subr.bf16.mxu0 %v1209_v10 }
 0x2bc   :  { %1091 = vmatmul.mubr.msk.bf16.vlgmr.msra.gmra.mrb[4].mxu0 %vm164_vm1, %v1286_v17 }
 0x2bd   :  { %1095 = vmatpush3.bf16.msra.mxu0 %v384_v50  ;;  %1096 = vmatprep.mubr.msk.bf16.mxu0 %vm1210_vm0, %v1209_v10 }
 0x2be   :  { %1120 = vmatprep.subr.bf16.mxu0 %v1173_v56 }
 0x2c4   :  { %1097 = vmatmul.mubr.msk.bf16.vlgmr.msra.gmra.mrb[8].mxu0 %vm164_vm1, %v1299_v19 }
 0x2c5   :  { %1121 = vmatpush3.bf16.msra.mxu0 %v1173_v56 }
 0x2c6   :  { %1122 = vmatprep.subr.bf16.mxu0 %v1174_v57 }
 0x2c9   :  { %1123 = vmatpush3.bf16.msra.mxu0 %v1174_v57 }
 0x2ca   :  { %1124 = vmatprep.subr.bf16.mxu0 %v1175_v58 }
 0x2cd   :  { %1125 = vmatpush3.bf16.msra.mxu0 %v1175_v58 }
 0x2ce   :  { %1126 = vmatprep.subr.bf16.mxu0 %v1176_v59 }
 0x2d1   :  { %1127 = vmatpush3.bf16.msra.mxu0 %v1176_v59 }
 0x2d2   :  { %1128 = vmatprep.subr.bf16.mxu0 %v1177_v60 }
 0x2d5   :  { %1129 = vmatpush3.bf16.msra.mxu0 %v1177_v60 }
 0x2d6   :  { %1130 = vmatprep.subr.bf16.mxu0 %v1178_v61 }
 0x2d9   :  { %1131 = vmatpush3.bf16.msra.mxu0 %v1178_v61 }
 0x2da   :  { %1132 = vmatprep.subr.bf16.mxu0 %v1179_v13 }
 0x2dd   :  { %1133 = vmatpush3.bf16.msra.mxu0 %v1179_v13 }
 0x2de   :  { %1134 = vmatprep.subr.bf16.mxu0 %v1180_v14 }
 0x2e1   :  { %1135 = vmatpush3.bf16.msra.mxu0 %v1180_v14 }
 0x38f   :  { %v419_v63 = vpop.f32.mrb[4].mxu0 }
 0x390   :  { %v472_v0 = vadd.f32 %v937_v62, %v419_v63  ;;  %v1092_v1 = vpop.f32.mrb[5].mxu0 }
 0x391   :  { %v422_v2 = vpop.f32.mrb[6].mxu0 }
 0x392   :  { %726 = vst [vmem:[%s1420_s5] sm:$0xff] %v472_v0  ;;  %v473_v3 = vadd.f32 %v937_v62, %v422_v2  ;;  %v1093_v4 = vpop.f32.mrb[7].mxu0 }
 0x394   :  { %v476_v5 = vpack.c.bf16 %v473_v3, %v472_v0  ;;  %727 = vst [vmem:[%s1420_s5 + $0x8] sm:$0xff] %v473_v3 }
 0x396   :  { %1116 = vmatprep.mubr.bf16.mxu1 %v476_v5 }
 0x397   :  { %v460_v6 = vpop.f32.mrb[8].mxu0 }
 0x398   :  { %v474_v7 = vadd.f32 %v937_v62, %v460_v6  ;;  %v1098_v8 = vpop.f32.mrb[9].mxu0 }
 0x399   :  { %v463_v9 = vpop.f32.mrb[10].mxu0 }
 0x39a   :  { %728 = vst [vmem:[%s1420_s5 + $0x10] sm:$0xff] %v474_v7  ;;  %v475_v10 = vadd.f32 %v937_v62, %v463_v9  ;;  %v1099_v11 = vpop.f32.mrb[11].mxu0 }
 0x39c   :  { %v477_v12 = vpack.c.bf16 %v475_v10, %v474_v7  ;;  %729 = vst [vmem:[%s1420_s5 + $0x18] sm:$0xff] %v475_v10 }
 0x39e   :  { %1117 = vmatmul.mubr.bf16.vlgmr.msra.gmra.mrb[12].mxu1 %v477_v12 }
 0x471   :  { %v1118_v16 = vpop.f32.mrb[12].mxu1 }
 0x472   :  { %v591_v17 = vadd.f32 %v1118_v16, %v954_v15  ;;  %v582_v18 = vpop.f32.mrb[13].mxu1 }
 0x473   :  { %v583_v19 = vadd.f32 %v954_v15, %v582_v18  ;;  %v1119_v20 = vpop.f32.mrb[14].mxu1 }
 0x474   :  { %v599_v21 = vmax.f32 %v591_v17, 0.0  ;;  %v594_v22 = vadd.f32 %v1119_v20, %v954_v15  ;;  %v585_v23 = vpop.f32.mrb[15].mxu1 }
 0x475   :  { %v586_v24 = vadd.f32 %v954_v15, %v585_v23  ;;  %v597_v25 = vmax.f32 %v583_v19, 0.0 }
 0x476   :  { %v600_v26 = vmax.f32 %v594_v22, 0.0  ;;  %v754_v27 = vmul.f32 %v599_v21, %v599_v21 }
 0x477   :  { %v598_v28 = vmax.f32 %v586_v24, 0.0  ;;  %v756_v31 = vmul.f32 %v597_v25, %v597_v25 }
 0x478   :  { %758 = vadd.xlane.f32.xlu1 %v754_v27  ;;  %v602_v30 = vpack.c.bf16 %v600_v26, %v599_v21 }
 0x479   :  { %v601_v29 = vpack.c.bf16 %v598_v28, %v597_v25 }
 0x47b   :  { %1136 = vmatprep.mubr.bf16.mxu0 %v601_v29 }
 0x47c   :  { %762 = vadd.xlane.f32.xlu1 %v756_v31  ;;  %1137 = vmatmul.mubr.bf16.vlgmr.msra.gmra.mrb[12].mxu0 %v602_v30 }
 0x505   :  { %v759_v45 = vpop.xlane.xlu1 %758 }
 0x506   :  { %v770_v47 = vmax.f32 %v759_v45, 1e-24 }
 0x509   :  { %v763_v49 = vpop.xlane.xlu1 %762 }
 0x50a   :  { %v772_v52 = vmax.f32 %v763_v49, 1e-24 }
 0x54f   :  { %v1138_v33 = vpop.f32.mrb[12].mxu0 }
 0x550   :  { %v716_v34 = vadd.f32 %v1138_v33, %v979_v32  ;;  %v707_v35 = vpop.f32.mrb[13].mxu0 }
 0x551   :  { %v708_v36 = vadd.f32 %v979_v32, %v707_v35  ;;  %v1139_v37 = vpop.f32.mrb[14].mxu0 }
 0x552   :  { %v724_v38 = vmax.f32 %v716_v34, 0.0  ;;  %v710_v39 = vpop.f32.mrb[15].mxu0 }
 0x553   :  { %v722_v40 = vmax.f32 %v708_v36, 0.0 }
 0x554   :  { %v732_v41 = vmul.f32 %v724_v38, %v597_v25  ;;  %v744_v43 = vmul.f32 %v724_v38, %v724_v38 }
 0x555   :  { %v742_v42 = vmul.f32 %v722_v40, %v722_v40  ;;  %v730_v44 = vmul.f32 %v722_v40, %v599_v21 }
 0x556   :  { %738 = vadd.xlane.f32.xlu1 %v732_v41 }
 0x557   :  { %746 = vadd.xlane.f32.xlu0 %v742_v42 }
 0x55b   :  { %750 = vadd.xlane.f32.xlu0 %v744_v43 }
 0x55f   :  { %734 = vadd.xlane.f32.xlu0 %v730_v44 }
 0x5e3   :  { %v739_v60 = vpop.xlane.xlu1 %738 }
 0x5e4   :  { %v747_v46 = vpop.xlane.xlu0 %746 }
 0x5e5   :  { %v766_v48 = vmax.f32 %v747_v46, 1e-24 }
 0x5e7   :  { %v774_v50 = vmul.f32 %v770_v47, %v766_v48 }
 0x5e8   :  { %v751_v51 = vpop.xlane.xlu0 %750 }
 0x5e9   :  { %1181 = vrsqrt.f32 %v774_v50  ;;  %v768_v53 = vmax.f32 %v751_v51, 1e-24 }
 0x5eb   :  { %v776_v54 = vmul.f32 %v772_v52, %v768_v53 }
 0x5ec   :  { %v735_v56 = vpop.xlane.xlu0 %734 }
 0x5ed   :  { %1183 = vrsqrt.f32 %v776_v54 }
 0x5f3   :  { %v1182_v55 = vpop.eup %1181 }
 0x5f4   :  { %v782_v57 = vmul.f32 %v1182_v55, %v735_v56 }
 0x5f6   :  { %v843_v58 = vmul.f32 2.0, %v782_v57 }
 0x5f7   :  { %v1184_v59 = vpop.eup %1183 }
 0x5f8   :  { %v784_v61 = vmul.f32 %v1184_v59, %v739_v60  ;;  %v847_v62 = vsub.f32 2.0, %v843_v58 }
 0x5fa   :  { %v845_v63 = vmul.f32 2.0, %v784_v61  ;;  %v856_v1 = vsel %vm855_vm2, %v847_v62, 0.0 }
 0x5fc   :  { %v849_v0 = vsub.f32 2.0, %v845_v63 }
 0x5fe   :  { %v859_v2 = vsel %vm855_vm2, %v849_v0, 0.0 }
 0x5ff   :  { %v860_v3 = vadd.f32 %v859_v2, %v856_v1 }
 0x601   :  { %863 = vadd.xlane.f32.xlu0 %v860_v3 }
 0x68e   :  { %v864_v4 = vpop.xlane.xlu0 %863 }
 0x68f   :  { %v865_v5 = vrot.slane %v864_v4, 4 }
 0x691   :  { %v866_v6 = vadd.f32 %v865_v5, %v864_v4 }
 0x693   :  { %v867_v7 = vrot.slane %v866_v6, 2 }
 0x695   :  { %v868_v8 = vadd.f32 %v867_v7, %v866_v6 }
 0x697   :  { %v869_v9 = vrot.slane %v868_v8, 1 }
 0x699   :  { %v870_v10 = vadd.f32 %v869_v9, %v868_v8 }
 0x69b   :  { %1140 = vpush %v870_v10 }
 0x6cc   :  { %s1141_s27 = spop %1140 }
 0x6cd   :  { %s874_s28 = smul.f32 0.125, %s1141_s27 }
 0x6cf   :  { %v875_v11 = vstv %s874_s28 }
 0x6d0   :  { %877 = vst.msk [vmem:[#allocation2] sm:$0x1] %vm876_vm3, %v875_v11 }
 0x6d1   :  { %1196 = shalt.err (!%p1193_p4)
}
 0x6d2   :  { %s1197_s9 = scalar_lea.hbm %s1421_s6, 16 }
 0x6d3   :  { %p1198_p5 = scmp.ne.s32.totalorder %s1421_s6, %s1197_s9  ;;  %p1201_p6 = scmp.lt.u32.totalorder %s1197_s9, %s1421_s6 }
 0x6d5   :  { %p1203_p7 = pnand %p1201_p6, %p1198_p5 }
 0x6d7   :  { %1206 = shalt.err (!%p1203_p7)
}
 0x6d8   :  { %889 = dma.vmem_to_hbm [thread:$0]  %s887_s1, 16, %s1421_s6, [#allocation3]  }
 0x6d9   :  { %1207 = dma.done.wait [#allocation3], 16  }
 0x6da   :  { %1208 = vsyncadd [#allocation3], 4294967280 }
 0x6db   :  { %895 = vsyncpa [#allocation3], 1 }

</bundles_post_ra>
